<compile_context>
chip_gen: v7x
topology: tpu7x:2x2x1
jax: 0.10.0
libtpu: 0.0.40
codegen_flags: <defaults>
</compile_context>

<pallas_src>
import jax
import jax.numpy as jnp
from jax.experimental import pallas as pl
from jax.experimental.pallas import tpu as pltpu

IN_DIM, HID_DIM, OUT_DIM = 20, 400, 784
HID_PAD = 512  # hidden dim zero-padded to a lane-dense multiple of 128


def _round_up(x, m):
    return ((x + m - 1) // m) * m


def decoder_kernel(z_ref, w1_ref, b1_ref, w2_ref, b2_ref, o_ref):
    # Linear(20 -> 512pad): bf16 MXU operands, f32 accumulation.
    h = jnp.dot(z_ref[...], w1_ref[...], preferred_element_type=jnp.float32)
    # Bias + ReLU in f32 on the VPU (padded hidden units are exactly 0).
    h = jnp.maximum(h + b1_ref[...], 0.0)
    # Linear(512pad -> 784): bf16 MXU operands, f32 accumulation. The output
    # keeps its true 784 width; Mosaic pads the MXU lane dim internally.
    y = jnp.dot(h.astype(jnp.bfloat16), w2_ref[...],
                preferred_element_type=jnp.float32)
    y = y + b2_ref[...]
    # Sigmoid via one EUP transcendental; exact and bounded in [0, 1].
    o_ref[...] = 0.5 * (jnp.tanh(0.5 * y) + 1.0)


def prepare_params(w1, b1, w2, b2):
    """One-time weight prep (hoisted out of the per-call path).

    Zero-pads the hidden dim 400 -> 512 and casts the MXU operands to bf16.
    Padded W1 columns / b1 entries are zero -> padded hidden units are 0 after
    ReLU; padded W2 rows are zero -> they contribute nothing to the output.
    """
    w1_p = jnp.zeros((IN_DIM, HID_PAD), jnp.bfloat16).at[:, :HID_DIM].set(
        jnp.asarray(w1).astype(jnp.bfloat16))
    b1_p = jnp.zeros((1, HID_PAD), jnp.float32).at[:, :HID_DIM].set(
        jnp.asarray(b1, jnp.float32).reshape(1, HID_DIM))
    w2_p = jnp.zeros((HID_PAD, OUT_DIM), jnp.bfloat16).at[:HID_DIM, :].set(
        jnp.asarray(w2).astype(jnp.bfloat16))
    b2_p = jnp.asarray(b2, jnp.float32).reshape(1, OUT_DIM)
    return w1_p, b1_p, w2_p, b2_p


def decoder_forward(z, params, *, tb=512):
    """z: [B, 20] f32 -> [B, 784] f32. `params` comes from prepare_params()."""
    w1_p, b1_p, w2_p, b2_p = params
    B = z.shape[0]

    # Batch tiling: multiple of 16 (bf16 sublane packing), clamped to the
    # padded batch, and -- when the batch is big enough -- capped so the grid
    # has >= 2 steps (lets the 'parallel' axis use both v7x TensorCores and
    # minimizes pad rows).
    b16 = _round_up(max(B, 1), 16)
    tb_cap = b16 if b16 < 32 else _round_up(pl.cdiv(b16, 2), 16)
    tb_eff = _round_up(max(16, min(tb, tb_cap)), 16)
    B_pad = _round_up(B, tb_eff)

    # Only the activation needs per-call prep; pad rows only if required.
    z_b = z.astype(jnp.bfloat16)
    if B_pad != B:
        z_b = jnp.zeros((B_pad, IN_DIM), jnp.bfloat16).at[:B].set(z_b)

    # Per-step VMEM (double-buffered output + z, resident weights): bump the
    # scoped limit only for very large tiles (e.g. caller-requested tb >= 2K).
    approx_vmem = (2 * (tb_eff * OUT_DIM * 4 + tb_eff * IN_DIM * 2)
                   + 2 * (HID_PAD * OUT_DIM * 2 + IN_DIM * HID_PAD * 2)
                   + 2 * (HID_PAD + OUT_DIM) * 4)
    if approx_vmem > 14 * (1 << 20):
        compiler_params = pltpu.CompilerParams(
            dimension_semantics=("parallel",),
            vmem_limit_bytes=min(approx_vmem * 2, 48 * (1 << 20)))
    else:
        compiler_params = pltpu.CompilerParams(
            dimension_semantics=("parallel",))

    grid = (B_pad // tb_eff,)
    out = pl.pallas_call(
        decoder_kernel,
        out_shape=jax.ShapeDtypeStruct((B_pad, OUT_DIM), jnp.float32),
        grid_spec=pltpu.PrefetchScalarGridSpec(
            num_scalar_prefetch=0,
            grid=grid,
            in_specs=[
                pl.BlockSpec((tb_eff, IN_DIM), lambda i: (i, 0)),    # z tile
                pl.BlockSpec((IN_DIM, HID_PAD), lambda i: (0, 0)),   # W1 (resident)
                pl.BlockSpec((1, HID_PAD), lambda i: (0, 0)),        # b1
                pl.BlockSpec((HID_PAD, OUT_DIM), lambda i: (0, 0)),  # W2 (resident)
                pl.BlockSpec((1, OUT_DIM), lambda i: (0, 0)),        # b2
            ],
            out_specs=pl.BlockSpec((tb_eff, OUT_DIM), lambda i: (i, 0)),
        ),
        compiler_params=compiler_params,
    )(z_b, w1_p, b1_p, w2_p, b2_p)

    if B_pad != B:
        out = out[:B]
    return out


def init_params(key):
    """Deterministic init mimicking PyTorch nn.Linear (uniform +-1/sqrt(fan_in))."""
    k1, k2, k3, k4 = jax.random.split(key, 4)
    bnd1 = 1.0 / (IN_DIM ** 0.5)
    bnd2 = 1.0 / (HID_DIM ** 0.5)
    w1 = jax.random.uniform(k1, (IN_DIM, HID_DIM), jnp.float32, -bnd1, bnd1)
    b1 = jax.random.uniform(k2, (1, HID_DIM), jnp.float32, -bnd1, bnd1)
    w2 = jax.random.uniform(k3, (HID_DIM, OUT_DIM), jnp.float32, -bnd2, bnd2)
    b2 = jax.random.uniform(k4, (1, OUT_DIM), jnp.float32, -bnd2, bnd2)
    return w1, b1, w2, b2


if __name__ == "__main__":
    key = jax.random.PRNGKey(0)
    kz, kp = jax.random.split(key)

    B = 8
    z = jax.random.normal(kz, (B, IN_DIM), jnp.float32)
    w1, b1, w2, b2 = init_params(kp)

    # One-time weight prep (bf16 cast + hidden-dim padding), reused per call.
    params = prepare_params(w1, b1, w2, b2)

    out = decoder_forward(z, params)
    out = jax.block_until_ready(out)

    # Pure-JAX f32 reference of the same math. The kernel uses bf16 MXU
    # operands with f32 accumulation, so it is not bit-identical to the f32
    # PyTorch reference -- hence the loose-but-safe tolerance.
    ref = jax.nn.sigmoid(jnp.maximum(z @ w1 + b1, 0.0) @ w2 + b2)
    assert out.shape == (B, OUT_DIM)
    assert bool(jnp.all(jnp.isfinite(out)))
    assert bool(jnp.all(out >= 0.0)) and bool(jnp.all(out <= 1.0))
    assert bool(jnp.allclose(out, ref, atol=2e-2)), float(
        jnp.max(jnp.abs(out - ref)))

    print("KERNEL_OK")
</pallas_src>

<mosaic_0001>
module attributes {stable_mosaic.version = 11 : i64} {
  func.func @decoder_kernel(%arg0: i32, %arg1: memref<16x20xbf16, #tpu.memory_space<vmem>>, %arg2: memref<20x512xbf16, #tpu.memory_space<vmem>>, %arg3: memref<1x512xf32, #tpu.memory_space<vmem>>, %arg4: memref<512x784xbf16, #tpu.memory_space<vmem>>, %arg5: memref<1x784xf32, #tpu.memory_space<vmem>>, %arg6: memref<16x784xf32, #tpu.memory_space<vmem>>) attributes {dimension_semantics = [#tpu.dimension_semantics<parallel>], iteration_bounds = array<i64: 1>, scalar_prefetch = 0 : i64, scratch_operands = 0 : i64, tpu.core_type = #tpu.core_type<tc>, window_params = [{transform_indices = @transform_0, window_bounds = array<i64: 16, 20>}, {pipeline_mode = #tpu.pipeline_mode<synchronous>, transform_indices = @transform_1, window_bounds = array<i64: 20, 512>}, {pipeline_mode = #tpu.pipeline_mode<synchronous>, transform_indices = @transform_2, window_bounds = array<i64: 1, 512>}, {pipeline_mode = #tpu.pipeline_mode<synchronous>, transform_indices = @transform_3, window_bounds = array<i64: 512, 784>}, {pipeline_mode = #tpu.pipeline_mode<synchronous>, transform_indices = @transform_4, window_bounds = array<i64: 1, 784>}, {transform_indices = @transform_5, window_bounds = array<i64: 16, 784>}]} {
    %c0 = arith.constant 0 : index
    %c0_0 = arith.constant 0 : index
    %0 = vector.load %arg1[%c0, %c0_0] : memref<16x20xbf16, #tpu.memory_space<vmem>>, vector<16x20xbf16>
    %c0_1 = arith.constant 0 : index
    %c0_2 = arith.constant 0 : index
    %1 = vector.load %arg2[%c0_1, %c0_2] : memref<20x512xbf16, #tpu.memory_space<vmem>>, vector<20x512xbf16>
    %cst = arith.constant dense<0.000000e+00> : vector<16x512xf32>
    %2 = tpu.matmul %0, %1, %cst {dimension_numbers = #tpu.dot_dimension_numbers<[1], [0], [0], [1], [0, 0, 1, 1], [], []>} : vector<16x20xbf16>, vector<20x512xbf16>, vector<16x512xf32> -> vector<16x512xf32>
    %c0_3 = arith.constant 0 : index
    %c0_4 = arith.constant 0 : index
    %3 = vector.load %arg3[%c0_3, %c0_4] : memref<1x512xf32, #tpu.memory_space<vmem>>, vector<1x512xf32>
    %4 = vector.broadcast %3 : vector<1x512xf32> to vector<16x512xf32>
    %5 = arith.addf %2, %4 : vector<16x512xf32>
    %cst_5 = arith.constant 0.000000e+00 : f32
    %6 = vector.broadcast %cst_5 : f32 to vector<16x512xf32>
    %7 = arith.maximumf %5, %6 : vector<16x512xf32>
    %8 = arith.truncf %7 : vector<16x512xf32> to vector<16x512xbf16>
    %c0_6 = arith.constant 0 : index
    %c0_7 = arith.constant 0 : index
    %9 = vector.load %arg4[%c0_6, %c0_7] : memref<512x784xbf16, #tpu.memory_space<vmem>>, vector<512x784xbf16>
    %cst_8 = arith.constant dense<0.000000e+00> : vector<16x784xf32>
    %10 = tpu.matmul %8, %9, %cst_8 {dimension_numbers = #tpu.dot_dimension_numbers<[1], [0], [0], [1], [0, 0, 1, 1], [], []>} : vector<16x512xbf16>, vector<512x784xbf16>, vector<16x784xf32> -> vector<16x784xf32>
    %c0_9 = arith.constant 0 : index
    %c0_10 = arith.constant 0 : index
    %11 = vector.load %arg5[%c0_9, %c0_10] : memref<1x784xf32, #tpu.memory_space<vmem>>, vector<1x784xf32>
    %12 = vector.broadcast %11 : vector<1x784xf32> to vector<16x784xf32>
    %13 = arith.addf %10, %12 : vector<16x784xf32>
    %cst_11 = arith.constant 5.000000e-01 : f32
    %14 = vector.broadcast %cst_11 : f32 to vector<16x784xf32>
    %15 = arith.mulf %14, %13 : vector<16x784xf32>
    %16 = math.tanh %15 : vector<16x784xf32>
    %cst_12 = arith.constant 1.000000e+00 : f32
    %17 = vector.broadcast %cst_12 : f32 to vector<16x784xf32>
    %18 = arith.addf %16, %17 : vector<16x784xf32>
    %cst_13 = arith.constant 5.000000e-01 : f32
    %19 = vector.broadcast %cst_13 : f32 to vector<16x784xf32>
    %20 = arith.mulf %19, %18 : vector<16x784xf32>
    %c0_14 = arith.constant 0 : index
    %c0_15 = arith.constant 0 : index
    %21 = vector.load %arg6[%c0_14, %c0_15] : memref<16x784xf32, #tpu.memory_space<vmem>>, vector<16x784xf32>
    tpu.vector_store %arg6[%c0_14, %c0_15], %20 {strides = array<i32>} : memref<16x784xf32, #tpu.memory_space<vmem>>, vector<16x784xf32>,
    return
  }
  func.func @transform_0(%arg0: i32) -> (i32, i32) {
    %c0_i32 = arith.constant 0 : i32
    %c0_i32_0 = arith.constant 0 : i32
    return %arg0, %c0_i32 : i32, i32
  }
  func.func @transform_1(%arg0: i32) -> (i32, i32) {
    %c0_i32 = arith.constant 0 : i32
    %c0_i32_0 = arith.constant 0 : i32
    %c0_i32_1 = arith.constant 0 : i32
    return %c0_i32, %c0_i32_0 : i32, i32
  }
  func.func @transform_2(%arg0: i32) -> (i32, i32) {
    %c0_i32 = arith.constant 0 : i32
    %c0_i32_0 = arith.constant 0 : i32
    %c0_i32_1 = arith.constant 0 : i32
    return %c0_i32, %c0_i32_0 : i32, i32
  }
  func.func @transform_3(%arg0: i32) -> (i32, i32) {
    %c0_i32 = arith.constant 0 : i32
    %c0_i32_0 = arith.constant 0 : i32
    %c0_i32_1 = arith.constant 0 : i32
    return %c0_i32, %c0_i32_0 : i32, i32
  }
  func.func @transform_4(%arg0: i32) -> (i32, i32) {
    %c0_i32 = arith.constant 0 : i32
    %c0_i32_0 = arith.constant 0 : i32
    %c0_i32_1 = arith.constant 0 : i32
    return %c0_i32, %c0_i32_0 : i32, i32
  }
  func.func @transform_5(%arg0: i32) -> (i32, i32) {
    %c0_i32 = arith.constant 0 : i32
    %c0_i32_0 = arith.constant 0 : i32
    return %arg0, %c0_i32 : i32, i32
  }
}

</mosaic_0001>

<bundles_post_ra>
// kernel: tpu_custom_call.1
= control target key start
LH: loop header
LB: loop body
LE: loop exit
PB: predicated region body
PF: predicated region fallthrough
CT: control target
= control target key end

     0   :  { %vm91_vm0 = vcmask 1041408   ;;  %v2766_v3 = vmov 0   ;;  %vm87_vm1 = vcmask 162816   ;;  %s3575_s0 = inlined_call_operand.vmem [shape: bf16[16,20], index: 0, kind: input, shape index: {}]   ;;  %s3576_s1 = inlined_call_operand.vmem [shape: bf16[20,512], index: 1, kind: input, shape index: {}]   ;;  %s3577_s2 = inlined_call_operand.vmem [shape: f32[1,512], index: 2, kind: input, shape index: {}]   ;;  %s3578_s3 = inlined_call_operand.vmem [shape: bf16[512,784], index: 3, kind: input, shape index: {}]   ;;  %s3579_s4 = inlined_call_operand.vmem [shape: f32[1,784], index: 4, kind: input, shape index: {}]   ;;  %s3580_s5 = inlined_call_operand.hbm [shape: f32[16,784], index: 5, kind: output, shape index: {}]  }
   0x1   :  { %v2383_v0 = vld [vmem:[%s3576_s1 + $0x4] ss:$16 sps:$4 sm:$0xff]   ;;  %v2385_v1 = vld [vmem:[%s3576_s1] ss:$16 sps:$4 sm:$0xff]   ;;  %136 = vmatprep.mubr.bf16.mxu1 %v2766_v3  ;;  %v2391_v6 = vld [vmem:[%s3576_s1 + $0xc] ss:$16 sps:$4 sm:$0xff]  }
   0x2   :  { %v28_v2 = vld [vmem:[%s3576_s1 + $0x20] sm:$0x33]  ;;  %104 = vmatprep.subr.bf16.mxu1 %v2383_v0  ;;  %v29_v8 = vld [vmem:[%s3576_s1 + $0x28] sm:$0x33]  ;;  %v2400_v13 = vld [vmem:[%s3578_s3 + $0x3c] ss:$28 sps:$4 sm:$0xff]  }
   0x3   :  { %v2080_v4 = vcombine.high %v28_v2, %v28_v2  ;;  %v2079_v5 = vcombine.low %v28_v2, %v28_v2  ;;  %105 = vmatpush1.bf16.msra.mxu1 %v2385_v1  ;;  %v2394_v9 = vld [vmem:[%s3578_s3 + $0x4] ss:$28 sps:$4 sm:$0xff]   ;;  %v2389_v11 = vld [vmem:[%s3576_s1 + $0x8] ss:$16 sps:$4 sm:$0xff]   ;;  %v2082_v14 = vcombine.high %v29_v8, %v29_v8  ;;  %v2081_v15 = vcombine.low %v29_v8, %v29_v8  ;;  %v2406_v17 = vld [vmem:[%s3578_s3 + $0x74] ss:$28 sps:$4 sm:$0xff]  }
   0x4   :  { %v2388_v10 = vld [vmem:[%s3575_s0] sm:$0xff]   ;;  %1647 = vmatprep.subr.bf16.mxu0 %v2394_v9  ;;  %v2405_v16 = vld [vmem:[%s3578_s3 + $0x38] ss:$28 sps:$4 sm:$0xff]   ;;  %v2398_v18 = vld [vmem:[%s3578_s3 + $0xc] ss:$28 sps:$4 sm:$0xff]  }
   0x5   :  { %2083 = vmatprep.subr.msk.bf16.mxu1 %vm91_vm0, %v2080_v4  ;;  %v93_v7 = vsel %vm91_vm0, %v2079_v5, 0  ;;  %v2399_v12 = vld [vmem:[%s3578_s3] ss:$28 sps:$4 sm:$0xff]   ;;  %v99_v19 = vsel %vm91_vm0, %v2081_v15, 0  ;;  %v2411_v20 = vld [vmem:[%s3578_s3 + $0x70] ss:$28 sps:$4 sm:$0xff]  }
   0x6   :  { %1648 = vmatpush1.bf16.msra.mxu0 %v2399_v12  ;;  %v2412_v21 = vld [vmem:[%s3578_s3 + $0xac] ss:$28 sps:$4 sm:$0xff]   ;;  %v2404_v23 = vld [vmem:[%s3578_s3 + $0x44] ss:$28 sps:$4 sm:$0xff]   ;;  %v2410_v27 = vld [vmem:[%s3578_s3 + $0x7c] ss:$28 sps:$4 sm:$0xff]  }
   0x7   :  { %107 = vmatpush1.bf16.msra.mxu1 %v93_v7  ;;  %1649 = vmatprep.subr.bf16.mxu0 %v2400_v13  ;;  %v2396_v22 = vld [vmem:[%s3578_s3 + $0x8] ss:$28 sps:$4 sm:$0xff]   ;;  %v2402_v26 = vld [vmem:[%s3578_s3 + $0x40] ss:$28 sps:$4 sm:$0xff]   ;;  %v2408_v30 = vld [vmem:[%s3578_s3 + $0x78] ss:$28 sps:$4 sm:$0xff]  }
   0x8   :  { %147 = vmatprep.subr.bf16.mxu1 %v2391_v6  ;;  %v2417_v24 = vld [vmem:[%s3578_s3 + $0xa8] ss:$28 sps:$4 sm:$0xff]   ;;  %v2423_v28 = vld [vmem:[%s3578_s3 + $0xe0] ss:$28 sps:$4 sm:$0xff]   ;;  %v2416_v31 = vld [vmem:[%s3578_s3 + $0xb4] ss:$28 sps:$4 sm:$0xff]  }
   0x9   :  { %v2418_v25 = vld [vmem:[%s3578_s3 + $0xe4] ss:$28 sps:$4 sm:$0xff]   ;;  %v2424_v29 = vld [vmem:[%s3578_s3 + $0x11c] ss:$28 sps:$4 sm:$0xff]   ;;  %v2430_v33 = vld [vmem:[%s3578_s3 + $0x154] ss:$28 sps:$4 sm:$0xff]  }
   0xa   :  { %2084 = vmatmul.mubr.msk.bf16.vlgmr.msra.gmra.mrb[0].mxu1 %vm87_vm1, %v2388_v10  ;;  %1650 = vmatpush1.bf16.msra.mxu0 %v2405_v16  ;;  %v2429_v32 = vld [vmem:[%s3578_s3 + $0x118] ss:$28 sps:$4 sm:$0xff]   ;;  %v2414_v34 = vld [vmem:[%s3578_s3 + $0xb0] ss:$28 sps:$4 sm:$0xff]   ;;  %v2420_v38 = vld [vmem:[%s3578_s3 + $0xe8] ss:$28 sps:$4 sm:$0xff]  }
   0xb   :  { %148 = vmatpush1.bf16.msra.mxu1 %v2389_v11  ;;  %179 = vmatprep.mubr.bf16.mxu1 %v2766_v3  ;;  %v2422_v35 = vld [vmem:[%s3578_s3 + $0xec] ss:$28 sps:$4 sm:$0xff]   ;;  %v2428_v39 = vld [vmem:[%s3578_s3 + $0x124] ss:$28 sps:$4 sm:$0xff]   ;;  %v2434_v43 = vld [vmem:[%s3578_s3 + $0x15c] ss:$28 sps:$4 sm:$0xff]  }
   0xc   :  { %2085 = vmatprep.subr.msk.bf16.mxu1 %vm91_vm0, %v2082_v14  ;;  %1651 = vmatprep.subr.bf16.mxu0 %v2406_v17  ;;  %v2435_v36 = vld [vmem:[%s3578_s3 + $0x150] ss:$28 sps:$4 sm:$0xff]   ;;  %v2441_v40 = vld [vmem:[%s3578_s3 + $0x188] ss:$28 sps:$4 sm:$0xff]   ;;  %v2426_v42 = vld [vmem:[%s3578_s3 + $0x120] ss:$28 sps:$4 sm:$0xff]  }
   0xd   :  { %v2436_v37 = vld [vmem:[%s3578_s3 + $0x18c] ss:$28 sps:$4 sm:$0xff]   ;;  %v2442_v41 = vld [vmem:[%s3578_s3 + $0x1c4] ss:$28 sps:$4 sm:$0xff]   ;;  %v2448_v45 = vld [vmem:[%s3578_s3 + $0x1fc] ss:$28 sps:$4 sm:$0xff]  }
   0xe   :  { %1652 = vmatpush1.bf16.msra.mxu0 %v2411_v20  ;;  %v2447_v44 = vld [vmem:[%s3578_s3 + $0x1c0] ss:$28 sps:$4 sm:$0xff]   ;;  %v2432_v46 = vld [vmem:[%s3578_s3 + $0x158] ss:$28 sps:$4 sm:$0xff]   ;;  %v2438_v49 = vld [vmem:[%s3578_s3 + $0x190] ss:$28 sps:$4 sm:$0xff]  }
   0xf   :  { %150 = vmatpush1.bf16.msra.mxu1 %v99_v19  ;;  %1653 = vmatprep.subr.bf16.mxu0 %v2412_v21  ;;  %v2440_v47 = vld [vmem:[%s3578_s3 + $0x194] ss:$28 sps:$4 sm:$0xff]   ;;  %v2446_v51 = vld [vmem:[%s3578_s3 + $0x1cc] ss:$28 sps:$4 sm:$0xff]   ;;  %v2452_v55 = vld [vmem:[%s3578_s3 + $0x204] ss:$28 sps:$4 sm:$0xff]  }
  0x10   :  { %1733 = vmatprep.subr.bf16.mxu1 %v2398_v18  ;;  %v2453_v48 = vld [vmem:[%s3578_s3 + $0x1f8] ss:$28 sps:$4 sm:$0xff]   ;;  %v2459_v52 = vld [vmem:[%s3578_s3 + $0x230] ss:$28 sps:$4 sm:$0xff]   ;;  %v2444_v54 = vld [vmem:[%s3578_s3 + $0x1c8] ss:$28 sps:$4 sm:$0xff]  }
  0x11   :  { %v2454_v50 = vld [vmem:[%s3578_s3 + $0x234] ss:$28 sps:$4 sm:$0xff]   ;;  %v2460_v53 = vld [vmem:[%s3578_s3 + $0x26c] ss:$28 sps:$4 sm:$0xff]   ;;  %v2466_v57 = vld [vmem:[%s3578_s3 + $0x2a4] ss:$28 sps:$4 sm:$0xff]  }
  0x12   :  { %2086 = vmatmul.mubr.msk.bf16.vlgmr.msra.gmra.mrb[4].mxu1 %vm87_vm1, %v2388_v10  ;;  %1654 = vmatpush1.bf16.msra.mxu0 %v2417_v24  ;;  %v2465_v56 = vld [vmem:[%s3578_s3 + $0x268] ss:$28 sps:$4 sm:$0xff]   ;;  %v2450_v58 = vld [vmem:[%s3578_s3 + $0x200] ss:$28 sps:$4 sm:$0xff]   ;;  %v2456_v62 = vld [vmem:[%s3578_s3 + $0x238] ss:$28 sps:$4 sm:$0xff]  }
  0x13   :  { %1734 = vmatpush1.bf16.msra.mxu1 %v2396_v22  ;;  %1655 = vmatprep.subr.bf16.mxu0 %v2418_v25  ;;  %v2458_v59 = vld [vmem:[%s3578_s3 + $0x23c] ss:$28 sps:$4 sm:$0xff]   ;;  %v2464_v63 = vld [vmem:[%s3578_s3 + $0x274] ss:$28 sps:$4 sm:$0xff]   ;;  %v2470_v2 = vld [vmem:[%s3578_s3 + $0x2ac] ss:$28 sps:$4 sm:$0xff]  }
  0x14   :  { %1735 = vmatprep.subr.bf16.mxu1 %v2404_v23  ;;  %v2471_v60 = vld [vmem:[%s3578_s3 + $0x2a0] ss:$28 sps:$4 sm:$0xff]   ;;  %v2477_v0 = vld [vmem:[%s3578_s3 + $0x2d8] ss:$28 sps:$4 sm:$0xff]   ;;  %v2462_v1 = vld [vmem:[%s3578_s3 + $0x270] ss:$28 sps:$4 sm:$0xff]  }
  0x15   :  { %v2472_v61 = vld [vmem:[%s3578_s3 + $0x2dc] ss:$28 sps:$4 sm:$0xff]   ;;  %v2468_v3 = vld [vmem:[%s3578_s3 + $0x2a8] ss:$28 sps:$4 sm:$0xff]   ;;  %v2478_v6 = vld [vmem:[%s3578_s3 + $0x314] ss:$28 sps:$4 sm:$0xff]  }
  0x16   :  { %1656 = vmatpush1.bf16.msra.mxu0 %v2423_v28  ;;  %v2476_v4 = vld [vmem:[%s3578_s3 + $0x2e4] ss:$28 sps:$4 sm:$0xff]   ;;  %v2482_v7 = vld [vmem:[%s3578_s3 + $0x31c] ss:$28 sps:$4 sm:$0xff]   ;;  %v2483_v9 = vld [vmem:[%s3578_s3 + $0x310] ss:$28 sps:$4 sm:$0xff]  }
  0x17   :  { %1736 = vmatpush1.bf16.msra.mxu1 %v2402_v26  ;;  %1657 = vmatprep.subr.bf16.mxu0 %v2424_v29  ;;  %v2474_v5 = vld [vmem:[%s3578_s3 + $0x2e0] ss:$28 sps:$4 sm:$0xff]   ;;  %v2480_v8 = vld [vmem:[%s3578_s3 + $0x318] ss:$28 sps:$4 sm:$0xff]   ;;  %v2484_v10 = vld [vmem:[%s3578_s3 + $0x34c] ss:$28 sps:$4 sm:$0xff]  }
  0x18   :  { %1737 = vmatprep.subr.bf16.mxu1 %v2410_v27  ;;  %v2488_v11 = vld [vmem:[%s3578_s3 + $0x354] ss:$28 sps:$4 sm:$0xff]   ;;  %v2489_v13 = vld [vmem:[%s3578_s3 + $0x348] ss:$28 sps:$4 sm:$0xff]  }
  0x19   :  { %v2486_v12 = vld [vmem:[%s3578_s3 + $0x350] ss:$28 sps:$4 sm:$0xff]   ;;  %v2492_v14 = vld [vmem:[%s3578_s3 + $0x384] ss:$28 sps:$4 sm:$0xff]  }
  0x1a   :  { %1658 = vmatpush1.bf16.msra.mxu0 %v2429_v32  ;;  %v2495_v15 = vld [vmem:[%s3578_s3 + $0x38c] ss:$28 sps:$4 sm:$0xff]  }
  0x1b   :  { %1738 = vmatpush1.bf16.msra.mxu1 %v2408_v30  ;;  %1659 = vmatprep.subr.bf16.mxu0 %v2430_v33 }
  0x1c   :  { %1739 = vmatprep.subr.bf16.mxu1 %v2416_v31 }
  0x1e   :  { %1660 = vmatpush1.bf16.msra.mxu0 %v2435_v36 }
  0x1f   :  { %1740 = vmatpush1.bf16.msra.mxu1 %v2414_v34  ;;  %1661 = vmatprep.subr.bf16.mxu0 %v2436_v37 }
  0x20   :  { %1741 = vmatprep.subr.bf16.mxu1 %v2422_v35 }
  0x22   :  { %1662 = vmatpush1.bf16.msra.mxu0 %v2441_v40 }
  0x23   :  { %1742 = vmatpush1.bf16.msra.mxu1 %v2420_v38  ;;  %1663 = vmatprep.subr.bf16.mxu0 %v2442_v41 }
  0x24   :  { %1743 = vmatprep.subr.bf16.mxu1 %v2428_v39 }
  0x26   :  { %1664 = vmatpush1.bf16.msra.mxu0 %v2447_v44 }
  0x27   :  { %1744 = vmatpush1.bf16.msra.mxu1 %v2426_v42  ;;  %1665 = vmatprep.subr.bf16.mxu0 %v2448_v45 }
  0x28   :  { %1745 = vmatprep.subr.bf16.mxu1 %v2434_v43 }
  0x2a   :  { %1666 = vmatpush1.bf16.msra.mxu0 %v2453_v48 }
  0x2b   :  { %1746 = vmatpush1.bf16.msra.mxu1 %v2432_v46  ;;  %1667 = vmatprep.subr.bf16.mxu0 %v2454_v50 }
  0x2c   :  { %1747 = vmatprep.subr.bf16.mxu1 %v2440_v47 }
  0x2e   :  { %1668 = vmatpush1.bf16.msra.mxu0 %v2459_v52 }
  0x2f   :  { %1748 = vmatpush1.bf16.msra.mxu1 %v2438_v49  ;;  %1669 = vmatprep.subr.bf16.mxu0 %v2460_v53 }
  0x30   :  { %1749 = vmatprep.subr.bf16.mxu1 %v2446_v51 }
  0x32   :  { %1670 = vmatpush1.bf16.msra.mxu0 %v2465_v56 }
  0x33   :  { %1750 = vmatpush1.bf16.msra.mxu1 %v2444_v54  ;;  %1671 = vmatprep.subr.bf16.mxu0 %v2466_v57 }
  0x34   :  { %1751 = vmatprep.subr.bf16.mxu1 %v2452_v55 }
  0x36   :  { %1672 = vmatpush1.bf16.msra.mxu0 %v2471_v60 }
  0x37   :  { %1752 = vmatpush1.bf16.msra.mxu1 %v2450_v58  ;;  %1673 = vmatprep.subr.bf16.mxu0 %v2472_v61 }
  0x38   :  { %1753 = vmatprep.subr.bf16.mxu1 %v2458_v59 }
  0x3a   :  { %1674 = vmatpush1.bf16.msra.mxu0 %v2477_v0 }
  0x3b   :  { %1754 = vmatpush1.bf16.msra.mxu1 %v2456_v62  ;;  %1675 = vmatprep.subr.bf16.mxu0 %v2478_v6 }
  0x3c   :  { %1755 = vmatprep.subr.bf16.mxu1 %v2464_v63 }
  0x3e   :  { %1676 = vmatpush1.bf16.msra.mxu0 %v2483_v9 }
  0x3f   :  { %1756 = vmatpush1.bf16.msra.mxu1 %v2462_v1  ;;  %1677 = vmatprep.subr.bf16.mxu0 %v2484_v10 }
  0x40   :  { %1757 = vmatprep.subr.bf16.mxu1 %v2470_v2 }
  0x42   :  { %1678 = vmatpush1.bf16.msra.mxu0 %v2489_v13 }
  0x43   :  { %1758 = vmatpush1.bf16.msra.mxu1 %v2468_v3  ;;  %1690 = vmatprep.subr.bf16.mxu0 %v2492_v14 }
  0x44   :  { %1759 = vmatprep.subr.bf16.mxu1 %v2476_v4 }
  0x47   :  { %1760 = vmatpush1.bf16.msra.mxu1 %v2474_v5 }
  0x48   :  { %1761 = vmatprep.subr.bf16.mxu1 %v2482_v7 }
  0x4b   :  { %1762 = vmatpush1.bf16.msra.mxu1 %v2480_v8 }
  0x4c   :  { %1763 = vmatprep.subr.bf16.mxu1 %v2488_v11 }
  0x4f   :  { %1764 = vmatpush1.bf16.msra.mxu1 %v2486_v12 }
  0x50   :  { %1776 = vmatprep.subr.bf16.mxu1 %v2495_v15 }
  0x51   :  { %10 = vsyncpa [#allocation3], 0  ;;  %v32_v16 = vlaneseq  ;;  %v30_v19 = vld [vmem:[%s3577_s2] sm:$0xf]  ;;  %v2493_v42 = vld [vmem:[%s3578_s3 + $0x388] ss:$28 sps:$4 sm:$0xff]  }
  0x52   :  { %v2490_v41 = vld [vmem:[%s3578_s3 + $0x380] ss:$28 sps:$4 sm:$0xff]   ;;  %v2496_v53 = vld [vmem:[%s3578_s3 + $0x3b8] ss:$28 sps:$4 sm:$0xff]   ;;  %v2502_v62 = vld [vmem:[%s3578_s3 + $0x3f0] ss:$28 sps:$4 sm:$0xff]  }
  0x53   :  { %v3025_v17 = vshrl.u32 %v32_v16, 7  ;;  %v2498_v44 = vld [vmem:[%s3578_s3 + $0x3bc] ss:$28 sps:$4 sm:$0xff]   ;;  %v2501_v45 = vld [vmem:[%s3578_s3 + $0x3c4] ss:$28 sps:$4 sm:$0xff]   ;;  %vm2049_vm2 = vcmask 130048  }
  0x54   :  { %v2499_v54 = vld [vmem:[%s3578_s3 + $0x3c0] ss:$28 sps:$4 sm:$0xff]   ;;  %v2504_v57 = vld [vmem:[%s3578_s3 + $0x3f4] ss:$28 sps:$4 sm:$0xff]   ;;  %v2510_v1 = vld [vmem:[%s3578_s3 + $0x42c] ss:$28 sps:$4 sm:$0xff]  }
  0x55   :  { %v34_v18 = vsub.s32 0, %v3025_v17  ;;  %v38_v20 = vsub.s32 1, %v3025_v17  ;;  %v42_v26 = vsub.s32 2, %v3025_v17  ;;  %v46_v29 = vsub.s32 3, %v3025_v17  ;;  %v2507_v58 = vld [vmem:[%s3578_s3 + $0x3fc] ss:$28 sps:$4 sm:$0xff]  }
  0x56   :  { %v2505_v63 = vld [vmem:[%s3578_s3 + $0x3f8] ss:$28 sps:$4 sm:$0xff]   ;;  %v2508_v3 = vld [vmem:[%s3578_s3 + $0x428] ss:$28 sps:$4 sm:$0xff]   ;;  %v2511_v4 = vld [vmem:[%s3578_s3 + $0x430] ss:$28 sps:$4 sm:$0xff]  }
  0x57   :  { %v35_v21 = vrot.slane %v30_v19, %v34_v18  ;;  %v39_v22 = vrot.slane %v30_v19, %v38_v20  ;;  %v43_v35 = vrot.slane %v30_v19, %v42_v26  ;;  %v47_v38 = vrot.slane %v30_v19, %v46_v29  ;;  %v2513_v2 = vld [vmem:[%s3578_s3 + $0x434] ss:$28 sps:$4 sm:$0xff]   ;;  %v2516_v5 = vld [vmem:[%s3578_s3 + $0x464] ss:$28 sps:$4 sm:$0xff]   ;;  %v2519_v6 = vld [vmem:[%s3578_s3 + $0x46c] ss:$28 sps:$4 sm:$0xff]  }
  0x58   :  { %v2514_v7 = vld [vmem:[%s3578_s3 + $0x460] ss:$28 sps:$4 sm:$0xff]   ;;  %v2517_v8 = vld [vmem:[%s3578_s3 + $0x468] ss:$28 sps:$4 sm:$0xff]   ;;  %v2520_v11 = vld [vmem:[%s3578_s3 + $0x498] ss:$28 sps:$4 sm:$0xff]  }
  0x59   :  { %v2522_v9 = vld [vmem:[%s3578_s3 + $0x49c] ss:$28 sps:$4 sm:$0xff]   ;;  %v2525_v10 = vld [vmem:[%s3578_s3 + $0x4a4] ss:$28 sps:$4 sm:$0xff]   ;;  %v2528_v13 = vld [vmem:[%s3578_s3 + $0x4d4] ss:$28 sps:$4 sm:$0xff]  }
  0x5a   :  { %v2523_v12 = vld [vmem:[%s3578_s3 + $0x4a0] ss:$28 sps:$4 sm:$0xff]   ;;  %v2526_v15 = vld [vmem:[%s3578_s3 + $0x4d0] ss:$28 sps:$4 sm:$0xff]   ;;  %v2529_v16 = vld [vmem:[%s3578_s3 + $0x4d8] ss:$28 sps:$4 sm:$0xff]  }
  0x5b   :  { %v2531_v14 = vld [vmem:[%s3578_s3 + $0x4dc] ss:$28 sps:$4 sm:$0xff]   ;;  %v2534_v19 = vld [vmem:[%s3578_s3 + $0x50c] ss:$28 sps:$4 sm:$0xff]  }
  0xdd   :  { %v138_v23 = vpop.f32.mrb[0].mxu1 }
  0xde   :  { %v139_v24 = vadd.f32 %v138_v23, %v35_v21  ;;  %v140_v25 = vpop.f32.mrb[1].mxu1  ;;  %v2535_v23 = vld [vmem:[%s3578_s3 + $0x510] ss:$28 sps:$4 sm:$0xff]  }
  0xdf   :  { %v141_v27 = vadd.f32 %v140_v25, %v39_v22  ;;  %v142_v28 = vpop.f32.mrb[2].mxu1  ;;  %v2543_v25 = vld [vmem:[%s3578_s3 + $0x54c] ss:$28 sps:$4 sm:$0xff]  }
  0xe0   :  { %v143_v30 = vadd.f32 %v142_v28, %v35_v21  ;;  %v144_v31 = vpop.f32.mrb[3].mxu1  ;;  %v190_v33 = vmax.f32 %v139_v24, 0.0  ;;  %v2537_v21 = vld [vmem:[%s3578_s3 + $0x514] ss:$28 sps:$4 sm:$0xff]   ;;  %v2540_v24 = vld [vmem:[%s3578_s3 + $0x544] ss:$28 sps:$4 sm:$0xff]  }
  0xe1   :  { %v145_v32 = vadd.f32 %v144_v31, %v39_v22  ;;  %v191_v36 = vmax.f32 %v141_v27, 0.0  ;;  %v2532_v22 = vld [vmem:[%s3578_s3 + $0x508] ss:$28 sps:$4 sm:$0xff]   ;;  %v2538_v27 = vld [vmem:[%s3578_s3 + $0x540] ss:$28 sps:$4 sm:$0xff]  }
  0xe2   :  { %v194_v34 = vmax.f32 %v143_v30, 0.0  ;;  %v2541_v28 = vld [vmem:[%s3578_s3 + $0x548] ss:$28 sps:$4 sm:$0xff]   ;;  %v2546_v30 = vld [vmem:[%s3578_s3 + $0x57c] ss:$28 sps:$4 sm:$0xff]  }
  0xe3   :  { %v195_v37 = vmax.f32 %v145_v32, 0.0  ;;  %v2549_v31 = vld [vmem:[%s3578_s3 + $0x584] ss:$28 sps:$4 sm:$0xff]   ;;  %v2544_v32 = vld [vmem:[%s3578_s3 + $0x578] ss:$28 sps:$4 sm:$0xff]  }
  0xe4   :  { %v3042_v39 = vpack.c.bf16 %v194_v34, %v190_v33  ;;  %v2547_v33 = vld [vmem:[%s3578_s3 + $0x580] ss:$28 sps:$4 sm:$0xff]   ;;  %v2552_v34 = vld [vmem:[%s3578_s3 + $0x5b4] ss:$28 sps:$4 sm:$0xff]  }
  0xe5   :  { %v3044_v40 = vpack.c.bf16 %v195_v37, %v191_v36  ;;  %v181_v43 = vpop.f32.mrb[4].mxu1  ;;  %v2550_v36 = vld [vmem:[%s3578_s3 + $0x5b0] ss:$28 sps:$4 sm:$0xff]   ;;  %v2553_v37 = vld [vmem:[%s3578_s3 + $0x5b8] ss:$28 sps:$4 sm:$0xff]  }
  0xe6   :  { %v182_v46 = vadd.f32 %v181_v43, %v43_v35  ;;  %v183_v47 = vpop.f32.mrb[5].mxu1  ;;  %v2559_v43 = vld [vmem:[%s3578_s3 + $0x5f0] ss:$28 sps:$4 sm:$0xff]  }
  0xe7   :  { %1679 = vmatprep.mubr.bf16.mxu0 %v3044_v40  ;;  %1765 = vmatprep.mubr.bf16.mxu1 %v3044_v40  ;;  %v184_v48 = vadd.f32 %v183_v47, %v47_v38  ;;  %v185_v49 = vpop.f32.mrb[6].mxu1  ;;  %v2565_v47 = vld [vmem:[%s3578_s3 + $0x628] ss:$28 sps:$4 sm:$0xff]  }
  0xe8   :  { %1680 = vmatmul.mubr.bf16.vlgmr.msra.gmra.mrb[0].mxu0 %v3042_v39  ;;  %1766 = vmatmul.mubr.bf16.vlgmr.msra.gmra.mrb[8].mxu1 %v3042_v39  ;;  %v192_v50 = vmax.f32 %v182_v46, 0.0  ;;  %v186_v51 = vadd.f32 %v185_v49, %v43_v35  ;;  %v187_v52 = vpop.f32.mrb[7].mxu1  ;;  %v2555_v35 = vld [vmem:[%s3578_s3 + $0x5bc] ss:$28 sps:$4 sm:$0xff]   ;;  %v2573_v49 = vld [vmem:[%s3578_s3 + $0x664] ss:$28 sps:$4 sm:$0xff]  }
  0xe9   :  { %1691 = vmatpush1.bf16.msra.mxu0 %v2490_v41  ;;  %1777 = vmatpush1.bf16.msra.mxu1 %v2493_v42  ;;  %v193_v55 = vmax.f32 %v184_v48, 0.0  ;;  %v188_v56 = vadd.f32 %v187_v52, %v47_v38  ;;  %v2558_v38 = vld [vmem:[%s3578_s3 + $0x5ec] ss:$28 sps:$4 sm:$0xff]   ;;  %v2561_v41 = vld [vmem:[%s3578_s3 + $0x5f4] ss:$28 sps:$4 sm:$0xff]  }
  0xea   :  { %1692 = vmatprep.subr.bf16.mxu0 %v2498_v44  ;;  %1778 = vmatprep.subr.bf16.mxu1 %v2501_v45  ;;  %v196_v59 = vmax.f32 %v186_v51, 0.0  ;;  %v2556_v42 = vld [vmem:[%s3578_s3 + $0x5e8] ss:$28 sps:$4 sm:$0xff]   ;;  %v2562_v46 = vld [vmem:[%s3578_s3 + $0x620] ss:$28 sps:$4 sm:$0xff]  }
  0xeb   :  { %v197_v60 = vmax.f32 %v188_v56, 0.0  ;;  %v2564_v44 = vld [vmem:[%s3578_s3 + $0x624] ss:$28 sps:$4 sm:$0xff]   ;;  %v2567_v45 = vld [vmem:[%s3578_s3 + $0x62c] ss:$28 sps:$4 sm:$0xff]  }
  0xec   :  { %v3074_v61 = vpack.c.bf16 %v196_v59, %v192_v50  ;;  %v2570_v48 = vld [vmem:[%s3578_s3 + $0x65c] ss:$28 sps:$4 sm:$0xff]   ;;  %v2576_v52 = vld [vmem:[%s3578_s3 + $0x694] ss:$28 sps:$4 sm:$0xff]   ;;  %v2582_v56 = vld [vmem:[%s3578_s3 + $0x6cc] ss:$28 sps:$4 sm:$0xff]  }
  0xed   :  { %1693 = vmatpush1.bf16.msra.mxu0 %v2496_v53  ;;  %1779 = vmatpush1.bf16.msra.mxu1 %v2499_v54  ;;  %v3082_v0 = vpack.c.bf16 %v197_v60, %v193_v55  ;;  %v2568_v50 = vld [vmem:[%s3578_s3 + $0x658] ss:$28 sps:$4 sm:$0xff]   ;;  %v2571_v51 = vld [vmem:[%s3578_s3 + $0x660] ss:$28 sps:$4 sm:$0xff]   ;;  %v2574_v54 = vld [vmem:[%s3578_s3 + $0x690] ss:$28 sps:$4 sm:$0xff]  }
  0xee   :  { %1694 = vmatprep.subr.bf16.mxu0 %v2504_v57  ;;  %1780 = vmatprep.subr.bf16.mxu1 %v2507_v58  ;;  %v2579_v53 = vld [vmem:[%s3578_s3 + $0x69c] ss:$28 sps:$4 sm:$0xff]   ;;  %v2585_v57 = vld [vmem:[%s3578_s3 + $0x6d4] ss:$28 sps:$4 sm:$0xff]   ;;  %v2580_v58 = vld [vmem:[%s3578_s3 + $0x6c8] ss:$28 sps:$4 sm:$0xff]  }
  0xef   :  { %1722 = vmatprep.mubr.bf16.mxu0 %v3082_v0  ;;  %1808 = vmatprep.mubr.bf16.mxu1 %v3082_v0  ;;  %v2577_v55 = vld [vmem:[%s3578_s3 + $0x698] ss:$28 sps:$4 sm:$0xff]   ;;  %v2583_v59 = vld [vmem:[%s3578_s3 + $0x6d0] ss:$28 sps:$4 sm:$0xff]  }
  0xf0   :  { %v2588_v60 = vld [vmem:[%s3578_s3 + $0x14] ss:$28 sps:$4 sm:$0xff]  }
  0xf1   :  { %1695 = vmatpush1.bf16.msra.mxu0 %v2502_v62  ;;  %1781 = vmatpush1.bf16.msra.mxu1 %v2505_v63  ;;  %v2589_v62 = vld [vmem:[%s3578_s3 + $0x1d8] ss:$28 sps:$4 sm:$0xff]   ;;  %v2586_v63 = vld [vmem:[%s3578_s3 + $0x10] ss:$28 sps:$4 sm:$0xff]  }
  0xf2   :  { %1696 = vmatprep.subr.bf16.mxu0 %v2510_v1  ;;  %1782 = vmatprep.subr.bf16.mxu1 %v2513_v2  ;;  %v2590_v1 = vld [vmem:[%s3578_s3 + $0x18] ss:$28 sps:$4 sm:$0xff]   ;;  %v2593_v2 = vld [vmem:[%s3578_s3 + $0x4c] ss:$28 sps:$4 sm:$0xff]  }
  0xf5   :  { %1697 = vmatpush1.bf16.msra.mxu0 %v2508_v3  ;;  %1783 = vmatpush1.bf16.msra.mxu1 %v2511_v4  ;;  %v2594_v3 = vld [vmem:[%s3578_s3 + $0x210] ss:$28 sps:$4 sm:$0xff]   ;;  %v2591_v4 = vld [vmem:[%s3578_s3 + $0x48] ss:$28 sps:$4 sm:$0xff]  }
  0xf6   :  { %1698 = vmatprep.subr.bf16.mxu0 %v2516_v5  ;;  %1784 = vmatprep.subr.bf16.mxu1 %v2519_v6  ;;  %v2595_v5 = vld [vmem:[%s3578_s3 + $0x50] ss:$28 sps:$4 sm:$0xff]   ;;  %v2598_v6 = vld [vmem:[%s3578_s3 + $0x84] ss:$28 sps:$4 sm:$0xff]  }
  0xf9   :  { %1699 = vmatpush1.bf16.msra.mxu0 %v2514_v7  ;;  %1785 = vmatpush1.bf16.msra.mxu1 %v2517_v8  ;;  %v2599_v7 = vld [vmem:[%s3578_s3 + $0x248] ss:$28 sps:$4 sm:$0xff]   ;;  %v2596_v8 = vld [vmem:[%s3578_s3 + $0x80] ss:$28 sps:$4 sm:$0xff]  }
  0xfa   :  { %1700 = vmatprep.subr.bf16.mxu0 %v2522_v9  ;;  %1786 = vmatprep.subr.bf16.mxu1 %v2525_v10  ;;  %v2603_v9 = vld [vmem:[%s3578_s3 + $0xbc] ss:$28 sps:$4 sm:$0xff]  }
  0xfb   :  { %v2604_v10 = vld [vmem:[%s3578_s3 + $0x280] ss:$28 sps:$4 sm:$0xff]  }
  0xfd   :  { %1701 = vmatpush1.bf16.msra.mxu0 %v2520_v11  ;;  %1787 = vmatpush1.bf16.msra.mxu1 %v2523_v12  ;;  %v2601_v11 = vld [vmem:[%s3578_s3 + $0xb8] ss:$28 sps:$4 sm:$0xff]   ;;  %v2605_v12 = vld [vmem:[%s3578_s3 + $0xc0] ss:$28 sps:$4 sm:$0xff]  }
  0xfe   :  { %1702 = vmatprep.subr.bf16.mxu0 %v2528_v13  ;;  %1788 = vmatprep.subr.bf16.mxu1 %v2531_v14  ;;  %v2608_v13 = vld [vmem:[%s3578_s3 + $0xf4] ss:$28 sps:$4 sm:$0xff]  }
  0xff   :  { %v2609_v14 = vld [vmem:[%s3578_s3 + $0x2b8] ss:$28 sps:$4 sm:$0xff]  }
 0x101   :  { %1703 = vmatpush1.bf16.msra.mxu0 %v2526_v15  ;;  %1789 = vmatpush1.bf16.msra.mxu1 %v2529_v16  ;;  %v2606_v15 = vld [vmem:[%s3578_s3 + $0xf0] ss:$28 sps:$4 sm:$0xff]   ;;  %v2610_v16 = vld [vmem:[%s3578_s3 + $0xf8] ss:$28 sps:$4 sm:$0xff]  }
 0x102   :  { %1704 = vmatprep.subr.bf16.mxu0 %v2534_v19  ;;  %1790 = vmatprep.subr.bf16.mxu1 %v2537_v21  ;;  %v2613_v19 = vld [vmem:[%s3578_s3 + $0x12c] ss:$28 sps:$4 sm:$0xff]  }
 0x103   :  { %v2614_v21 = vld [vmem:[%s3578_s3 + $0x2f0] ss:$28 sps:$4 sm:$0xff]  }
 0x105   :  { %1705 = vmatpush1.bf16.msra.mxu0 %v2532_v22  ;;  %1791 = vmatpush1.bf16.msra.mxu1 %v2535_v23  ;;  %v2611_v22 = vld [vmem:[%s3578_s3 + $0x128] ss:$28 sps:$4 sm:$0xff]   ;;  %v2615_v23 = vld [vmem:[%s3578_s3 + $0x130] ss:$28 sps:$4 sm:$0xff]  }
 0x106   :  { %1706 = vmatprep.subr.bf16.mxu0 %v2540_v24  ;;  %1792 = vmatprep.subr.bf16.mxu1 %v2543_v25  ;;  %v2618_v24 = vld [vmem:[%s3578_s3 + $0x164] ss:$28 sps:$4 sm:$0xff]  }
 0x107   :  { %v2619_v25 = vld [vmem:[%s3578_s3 + $0x328] ss:$28 sps:$4 sm:$0xff]  }
 0x109   :  { %1707 = vmatpush1.bf16.msra.mxu0 %v2538_v27  ;;  %1793 = vmatpush1.bf16.msra.mxu1 %v2541_v28  ;;  %v2616_v27 = vld [vmem:[%s3578_s3 + $0x160] ss:$28 sps:$4 sm:$0xff]   ;;  %v2620_v28 = vld [vmem:[%s3578_s3 + $0x168] ss:$28 sps:$4 sm:$0xff]  }
 0x10a   :  { %1708 = vmatprep.subr.bf16.mxu0 %v2546_v30  ;;  %1794 = vmatprep.subr.bf16.mxu1 %v2549_v31  ;;  %v2623_v30 = vld [vmem:[%s3578_s3 + $0x19c] ss:$28 sps:$4 sm:$0xff]  }
 0x10b   :  { %v2624_v31 = vld [vmem:[%s3578_s3 + $0x360] ss:$28 sps:$4 sm:$0xff]  }
 0x10d   :  { %1709 = vmatpush1.bf16.msra.mxu0 %v2544_v32  ;;  %1795 = vmatpush1.bf16.msra.mxu1 %v2547_v33  ;;  %v2621_v32 = vld [vmem:[%s3578_s3 + $0x198] ss:$28 sps:$4 sm:$0xff]   ;;  %v2625_v33 = vld [vmem:[%s3578_s3 + $0x1a0] ss:$28 sps:$4 sm:$0xff]  }
 0x10e   :  { %1710 = vmatprep.subr.bf16.mxu0 %v2552_v34  ;;  %1796 = vmatprep.subr.bf16.mxu1 %v2555_v35  ;;  %v2628_v34 = vld [vmem:[%s3578_s3 + $0x1d4] ss:$28 sps:$4 sm:$0xff]  }
 0x10f   :  { %v2629_v35 = vld [vmem:[%s3578_s3 + $0x558] ss:$28 sps:$4 sm:$0xff]  }
 0x111   :  { %1711 = vmatpush1.bf16.msra.mxu0 %v2550_v36  ;;  %1797 = vmatpush1.bf16.msra.mxu1 %v2553_v37  ;;  %v2626_v36 = vld [vmem:[%s3578_s3 + $0x1d0] ss:$28 sps:$4 sm:$0xff]   ;;  %v2630_v37 = vld [vmem:[%s3578_s3 + $0x398] ss:$28 sps:$4 sm:$0xff]  }
 0x112   :  { %1712 = vmatprep.subr.bf16.mxu0 %v2558_v38  ;;  %1798 = vmatprep.subr.bf16.mxu1 %v2561_v41  ;;  %v2633_v38 = vld [vmem:[%s3578_s3 + $0x20c] ss:$28 sps:$4 sm:$0xff]  }
 0x113   :  { %v2634_v41 = vld [vmem:[%s3578_s3 + $0x590] ss:$28 sps:$4 sm:$0xff]  }
 0x115   :  { %1713 = vmatpush1.bf16.msra.mxu0 %v2556_v42  ;;  %1799 = vmatpush1.bf16.msra.mxu1 %v2559_v43  ;;  %v2631_v42 = vld [vmem:[%s3578_s3 + $0x208] ss:$28 sps:$4 sm:$0xff]   ;;  %v2635_v43 = vld [vmem:[%s3578_s3 + $0x3d0] ss:$28 sps:$4 sm:$0xff]  }
 0x116   :  { %1714 = vmatprep.subr.bf16.mxu0 %v2564_v44  ;;  %1800 = vmatprep.subr.bf16.mxu1 %v2567_v45  ;;  %v2638_v44 = vld [vmem:[%s3578_s3 + $0x244] ss:$28 sps:$4 sm:$0xff]  }
 0x117   :  { %v2639_v45 = vld [vmem:[%s3578_s3 + $0x5c8] ss:$28 sps:$4 sm:$0xff]  }
 0x119   :  { %1715 = vmatpush1.bf16.msra.mxu0 %v2562_v46  ;;  %1801 = vmatpush1.bf16.msra.mxu1 %v2565_v47  ;;  %v2636_v46 = vld [vmem:[%s3578_s3 + $0x240] ss:$28 sps:$4 sm:$0xff]   ;;  %v2640_v47 = vld [vmem:[%s3578_s3 + $0x408] ss:$28 sps:$4 sm:$0xff]  }
 0x11a   :  { %1716 = vmatprep.subr.bf16.mxu0 %v2570_v48  ;;  %1802 = vmatprep.subr.bf16.mxu1 %v2573_v49  ;;  %v2643_v48 = vld [vmem:[%s3578_s3 + $0x27c] ss:$28 sps:$4 sm:$0xff]  }
 0x11b   :  { %v2644_v49 = vld [vmem:[%s3578_s3 + $0x600] ss:$28 sps:$4 sm:$0xff]  }
 0x11d   :  { %1717 = vmatpush1.bf16.msra.mxu0 %v2568_v50  ;;  %1803 = vmatpush1.bf16.msra.mxu1 %v2571_v51  ;;  %v2641_v50 = vld [vmem:[%s3578_s3 + $0x278] ss:$28 sps:$4 sm:$0xff]   ;;  %v2645_v51 = vld [vmem:[%s3578_s3 + $0x440] ss:$28 sps:$4 sm:$0xff]  }
 0x11e   :  { %1718 = vmatprep.subr.bf16.mxu0 %v2576_v52  ;;  %1804 = vmatprep.subr.bf16.mxu1 %v2579_v53  ;;  %v2648_v52 = vld [vmem:[%s3578_s3 + $0x2b4] ss:$28 sps:$4 sm:$0xff]  }
 0x11f   :  { %v2649_v53 = vld [vmem:[%s3578_s3 + $0x638] ss:$28 sps:$4 sm:$0xff]  }
 0x121   :  { %1719 = vmatpush1.bf16.msra.mxu0 %v2574_v54  ;;  %1805 = vmatpush1.bf16.msra.mxu1 %v2577_v55  ;;  %v2646_v54 = vld [vmem:[%s3578_s3 + $0x2b0] ss:$28 sps:$4 sm:$0xff]   ;;  %v2650_v55 = vld [vmem:[%s3578_s3 + $0x478] ss:$28 sps:$4 sm:$0xff]  }
 0x122   :  { %1720 = vmatprep.subr.bf16.mxu0 %v2582_v56  ;;  %1806 = vmatprep.subr.bf16.mxu1 %v2585_v57  ;;  %v2653_v56 = vld [vmem:[%s3578_s3 + $0x2ec] ss:$28 sps:$4 sm:$0xff]  }
 0x123   :  { %v2654_v57 = vld [vmem:[%s3578_s3 + $0x670] ss:$28 sps:$4 sm:$0xff]  }
 0x125   :  { %1721 = vmatpush1.bf16.msra.mxu0 %v2580_v58  ;;  %1807 = vmatpush1.bf16.msra.mxu1 %v2583_v59  ;;  %v2651_v58 = vld [vmem:[%s3578_s3 + $0x2e8] ss:$28 sps:$4 sm:$0xff]   ;;  %v2655_v59 = vld [vmem:[%s3578_s3 + $0x4b0] ss:$28 sps:$4 sm:$0xff]  }
 0x126   :  { %1819 = vmatprep.subr.bf16.mxu0 %v2588_v60  ;;  %2311 = vmatprep.subr.bf16.mxu1 %v2589_v62  ;;  %v2658_v60 = vld [vmem:[%s3578_s3 + $0x324] ss:$28 sps:$4 sm:$0xff]  }
 0x127   :  { %v2659_v62 = vld [vmem:[%s3578_s3 + $0x6a8] ss:$28 sps:$4 sm:$0xff]  }
 0x128   :  { %1723 = vmatmul.mubr.bf16.vlgmr.msra.gmra.mrb[0].mxu0 %v3074_v61  ;;  %1809 = vmatmul.mubr.bf16.vlgmr.msra.gmra.mrb[8].mxu1 %v3074_v61 }
 0x129   :  { %1820 = vmatpush1.bf16.msra.mxu0 %v2586_v63  ;;  %1851 = vmatprep.mubr.bf16.mxu0 %v3044_v40  ;;  %v2656_v63 = vld [vmem:[%s3578_s3 + $0x320] ss:$28 sps:$4 sm:$0xff]  }
 0x12a   :  { %2312 = vmatpush3.bf16.msra.mxu1 %v2590_v1  ;;  %1937 = vmatprep.mubr.bf16.mxu1 %v3044_v40  ;;  %v2600_v40 = vld [vmem:[%s3578_s3 + $0x88] ss:$28 sps:$4 sm:$0xff]  }
 0x12b   :  { %1821 = vmatprep.subr.bf16.mxu0 %v2593_v2  ;;  %2313 = vmatprep.subr.bf16.mxu1 %v2594_v3  ;;  %v2660_v1 = vld [vmem:[%s3578_s3 + $0x4e8] ss:$28 sps:$4 sm:$0xff]   ;;  %v2663_v2 = vld [vmem:[%s3578_s3 + $0x35c] ss:$28 sps:$4 sm:$0xff]  }
 0x12c   :  { %v2664_v3 = vld [vmem:[%s3578_s3 + $0x6e0] ss:$28 sps:$4 sm:$0xff]  }
 0x12d   :  { %1822 = vmatpush1.bf16.msra.mxu0 %v2591_v4  ;;  %v2661_v4 = vld [vmem:[%s3578_s3 + $0x358] ss:$28 sps:$4 sm:$0xff]  }
 0x12e   :  { %2314 = vmatpush3.bf16.msra.mxu1 %v2595_v5  ;;  %1823 = vmatprep.subr.bf16.mxu0 %v2598_v6  ;;  %v2665_v5 = vld [vmem:[%s3578_s3 + $0x520] ss:$28 sps:$4 sm:$0xff]   ;;  %v2668_v6 = vld [vmem:[%s3578_s3 + $0x394] ss:$28 sps:$4 sm:$0xff]  }
 0x12f   :  { %2315 = vmatprep.subr.bf16.mxu1 %v2599_v7  ;;  %v2666_v7 = vld [vmem:[%s3578_s3 + $0x390] ss:$28 sps:$4 sm:$0xff]  }
 0x131   :  { %1824 = vmatpush1.bf16.msra.mxu0 %v2596_v8  ;;  %v2671_v8 = vld [vmem:[%s3578_s3 + $0x3cc] ss:$28 sps:$4 sm:$0xff]  }
 0x132   :  { %2316 = vmatpush3.bf16.msra.mxu1 %v2600_v40  ;;  %1825 = vmatprep.subr.bf16.mxu0 %v2603_v9  ;;  %v2669_v40 = vld [vmem:[%s3578_s3 + $0x3c8] ss:$28 sps:$4 sm:$0xff]  }
 0x133   :  { %2317 = vmatprep.subr.bf16.mxu1 %v2604_v10  ;;  %v2674_v9 = vld [vmem:[%s3578_s3 + $0x404] ss:$28 sps:$4 sm:$0xff]  }
 0x134   :  { %v2672_v10 = vld [vmem:[%s3578_s3 + $0x400] ss:$28 sps:$4 sm:$0xff]  }
 0x135   :  { %1826 = vmatpush1.bf16.msra.mxu0 %v2601_v11  ;;  %v2680_v11 = vld [vmem:[%s3578_s3 + $0x474] ss:$28 sps:$4 sm:$0xff]  }
 0x136   :  { %2318 = vmatpush3.bf16.msra.mxu1 %v2605_v12  ;;  %1827 = vmatprep.subr.bf16.mxu0 %v2608_v13  ;;  %v2678_v12 = vld [vmem:[%s3578_s3 + $0x470] ss:$28 sps:$4 sm:$0xff]  }
 0x137   :  { %2319 = vmatprep.subr.bf16.mxu1 %v2609_v14  ;;  %v2683_v13 = vld [vmem:[%s3578_s3 + $0x4ac] ss:$28 sps:$4 sm:$0xff]  }
 0x138   :  { %v2681_v14 = vld [vmem:[%s3578_s3 + $0x4a8] ss:$28 sps:$4 sm:$0xff]  }
 0x139   :  { %1828 = vmatpush1.bf16.msra.mxu0 %v2606_v15  ;;  %v2686_v15 = vld [vmem:[%s3578_s3 + $0x4e4] ss:$28 sps:$4 sm:$0xff]  }
 0x13a   :  { %2320 = vmatpush3.bf16.msra.mxu1 %v2610_v16  ;;  %1829 = vmatprep.subr.bf16.mxu0 %v2613_v19  ;;  %v2684_v16 = vld [vmem:[%s3578_s3 + $0x4e0] ss:$28 sps:$4 sm:$0xff]  }
 0x13b   :  { %2321 = vmatprep.subr.bf16.mxu1 %v2614_v21  ;;  %v2689_v19 = vld [vmem:[%s3578_s3 + $0x51c] ss:$28 sps:$4 sm:$0xff]  }
 0x13c   :  { %v2687_v21 = vld [vmem:[%s3578_s3 + $0x518] ss:$28 sps:$4 sm:$0xff]  }
 0x13d   :  { %1830 = vmatpush1.bf16.msra.mxu0 %v2611_v22  ;;  %v2692_v22 = vld [vmem:[%s3578_s3 + $0x554] ss:$28 sps:$4 sm:$0xff]  }
 0x13e   :  { %2322 = vmatpush3.bf16.msra.mxu1 %v2615_v23  ;;  %1831 = vmatprep.subr.bf16.mxu0 %v2618_v24  ;;  %v2690_v23 = vld [vmem:[%s3578_s3 + $0x550] ss:$28 sps:$4 sm:$0xff]  }
 0x13f   :  { %2323 = vmatprep.subr.bf16.mxu1 %v2619_v25  ;;  %v2695_v24 = vld [vmem:[%s3578_s3 + $0x58c] ss:$28 sps:$4 sm:$0xff]  }
 0x140   :  { %v2693_v25 = vld [vmem:[%s3578_s3 + $0x588] ss:$28 sps:$4 sm:$0xff]  }
 0x141   :  { %1832 = vmatpush1.bf16.msra.mxu0 %v2616_v27  ;;  %v2698_v27 = vld [vmem:[%s3578_s3 + $0x5c4] ss:$28 sps:$4 sm:$0xff]  }
 0x142   :  { %2324 = vmatpush3.bf16.msra.mxu1 %v2620_v28  ;;  %1833 = vmatprep.subr.bf16.mxu0 %v2623_v30  ;;  %v2696_v28 = vld [vmem:[%s3578_s3 + $0x5c0] ss:$28 sps:$4 sm:$0xff]  }
 0x143   :  { %2325 = vmatprep.subr.bf16.mxu1 %v2624_v31  ;;  %v2701_v30 = vld [vmem:[%s3578_s3 + $0x5fc] ss:$28 sps:$4 sm:$0xff]  }
 0x144   :  { %v2699_v31 = vld [vmem:[%s3578_s3 + $0x5f8] ss:$28 sps:$4 sm:$0xff]  }
 0x145   :  { %1834 = vmatpush1.bf16.msra.mxu0 %v2621_v32  ;;  %v2704_v32 = vld [vmem:[%s3578_s3 + $0x634] ss:$28 sps:$4 sm:$0xff]  }
 0x146   :  { %2326 = vmatpush3.bf16.msra.mxu1 %v2625_v33  ;;  %1835 = vmatprep.subr.bf16.mxu0 %v2628_v34  ;;  %v2702_v33 = vld [vmem:[%s3578_s3 + $0x630] ss:$28 sps:$4 sm:$0xff]  }
 0x147   :  { %2333 = vmatprep.subr.bf16.mxu1 %v2629_v35  ;;  %v2707_v34 = vld [vmem:[%s3578_s3 + $0x66c] ss:$28 sps:$4 sm:$0xff]  }
 0x148   :  { %v2705_v35 = vld [vmem:[%s3578_s3 + $0x668] ss:$28 sps:$4 sm:$0xff]  }
 0x149   :  { %1938 = vmatmul.mubr.bf16.vlgmr.msra.gmra.mrb[12].mxu1 %v3042_v39  ;;  %1836 = vmatpush1.bf16.msra.mxu0 %v2626_v36  ;;  %v2710_v36 = vld [vmem:[%s3578_s3 + $0x6a4] ss:$28 sps:$4 sm:$0xff]  }
 0x14a   :  { %2334 = vmatpush3.bf16.msra.mxu1 %v2630_v37  ;;  %1978 = vmatprep.mubr.bf16.mxu1 %v3082_v0  ;;  %v2708_v37 = vld [vmem:[%s3578_s3 + $0x6a0] ss:$28 sps:$4 sm:$0xff]  }
 0x14b   :  { %1837 = vmatprep.subr.bf16.mxu0 %v2633_v38  ;;  %2335 = vmatprep.subr.bf16.mxu1 %v2634_v41  ;;  %v2713_v38 = vld [vmem:[%s3578_s3 + $0x6dc] ss:$28 sps:$4 sm:$0xff]  }
 0x14c   :  { %v2711_v41 = vld [vmem:[%s3578_s3 + $0x6d8] ss:$28 sps:$4 sm:$0xff]  }
 0x14d   :  { %1838 = vmatpush1.bf16.msra.mxu0 %v2631_v42  ;;  %v3543_v42 = vld [vmem:[%s3579_s4] sm:$0x7f] }
 0x14e   :  { %2336 = vmatpush3.bf16.msra.mxu1 %v2635_v43  ;;  %1839 = vmatprep.subr.bf16.mxu0 %v2638_v44  ;;  %v463_v43 = vrot.slane %v3543_v42, %v34_v18  ;;  %v471_v44 = vrot.slane %v3543_v42, %v42_v26 }
 0x14f   :  { %2337 = vmatprep.subr.bf16.mxu1 %v2639_v45  ;;  %v467_v45 = vrot.slane %v3543_v42, %v38_v20 }
 0x151   :  { %1840 = vmatpush1.bf16.msra.mxu0 %v2636_v46 }
 0x152   :  { %2338 = vmatpush3.bf16.msra.mxu1 %v2640_v47  ;;  %1841 = vmatprep.subr.bf16.mxu0 %v2643_v48 }
 0x153   :  { %2339 = vmatprep.subr.bf16.mxu1 %v2644_v49 }
 0x155   :  { %1842 = vmatpush1.bf16.msra.mxu0 %v2641_v50 }
 0x156   :  { %2340 = vmatpush3.bf16.msra.mxu1 %v2645_v51  ;;  %1843 = vmatprep.subr.bf16.mxu0 %v2648_v52 }
 0x157   :  { %2341 = vmatprep.subr.bf16.mxu1 %v2649_v53 }
 0x159   :  { %1844 = vmatpush1.bf16.msra.mxu0 %v2646_v54 }
 0x15a   :  { %2342 = vmatpush3.bf16.msra.mxu1 %v2650_v55  ;;  %1845 = vmatprep.subr.bf16.mxu0 %v2653_v56 }
 0x15b   :  { %2343 = vmatprep.subr.bf16.mxu1 %v2654_v57 }
 0x15d   :  { %1846 = vmatpush1.bf16.msra.mxu0 %v2651_v58 }
 0x15e   :  { %2344 = vmatpush3.bf16.msra.mxu1 %v2655_v59  ;;  %1847 = vmatprep.subr.bf16.mxu0 %v2658_v60 }
 0x15f   :  { %2345 = vmatprep.subr.bf16.mxu1 %v2659_v62 }
 0x161   :  { %1848 = vmatpush1.bf16.msra.mxu0 %v2656_v63 }
 0x162   :  { %2346 = vmatpush3.bf16.msra.mxu1 %v2660_v1  ;;  %1849 = vmatprep.subr.bf16.mxu0 %v2663_v2 }
 0x163   :  { %2347 = vmatprep.subr.bf16.mxu1 %v2664_v3 }
 0x165   :  { %1850 = vmatpush1.bf16.msra.mxu0 %v2661_v4 }
 0x166   :  { %2348 = vmatpush3.bf16.msra.mxu1 %v2665_v5  ;;  %1862 = vmatprep.subr.bf16.mxu0 %v2668_v6 }
 0x168   :  { %1852 = vmatmul.mubr.bf16.vlgmr.msra.gmra.mrb[4].mxu0 %v3042_v39  ;;  %v2677_v39 = vld [vmem:[%s3578_s3 + $0x43c] ss:$28 sps:$4 sm:$0xff]  }
 0x169   :  { %1979 = vmatmul.mubr.bf16.vlgmr.msra.gmra.mrb[16].mxu1 %v3074_v61  ;;  %1863 = vmatpush1.bf16.msra.mxu0 %v2666_v7 }
 0x16a   :  { %1894 = vmatprep.mubr.bf16.mxu0 %v3082_v0  ;;  %1864 = vmatprep.subr.bf16.mxu0 %v2671_v8  ;;  %v2675_v0 = vld [vmem:[%s3578_s3 + $0x438] ss:$28 sps:$4 sm:$0xff]   ;;  %s2767_s3 = smov [#allocation2]  }
 0x16b   :  { %s2063_s4 = sshll.u32 %s2767_s3, 4  ;;  %s2064_s4 = int_to_ptr.vmem [resolvable:$true] %s2063_s4 }
 0x16c   :  { %s2742_s1 = scalar_lea.vmem %s2064_s4, 1792  ;;  %p2747_p1 = scmp.lt.s32.totalorder %s2064_s4, %s2064_s4 }
 0x16d   :  { %1865 = vmatpush1.bf16.msra.mxu0 %v2669_v40  ;;  %p2743_p0 = scmp.ne.s32.totalorder %s2064_s4, %s2742_s1  ;;  %p2748_p2 = scmp.lt.s32.totalorder %s2742_s1, %s2742_s1 }
 0x16e   :  { %1866 = vmatprep.subr.bf16.mxu0 %v2674_v9 }
 0x16f   :  { %p2749_p3 = por %p2748_p2, %p2747_p1 }
 0x171   :  { %1867 = vmatpush1.bf16.msra.mxu0 %v2672_v10  ;;  %p2750_p4 = pnand %p2749_p3, %p2743_p0 }
 0x172   :  { %1868 = vmatprep.subr.bf16.mxu0 %v2677_v39 }
 0x175   :  { %1869 = vmatpush1.bf16.msra.mxu0 %v2675_v0 }
 0x176   :  { %1870 = vmatprep.subr.bf16.mxu0 %v2680_v11 }
 0x179   :  { %1871 = vmatpush1.bf16.msra.mxu0 %v2678_v12 }
 0x17a   :  { %1872 = vmatprep.subr.bf16.mxu0 %v2683_v13 }
 0x17d   :  { %1873 = vmatpush1.bf16.msra.mxu0 %v2681_v14 }
 0x17e   :  { %1874 = vmatprep.subr.bf16.mxu0 %v2686_v15 }
 0x181   :  { %1875 = vmatpush1.bf16.msra.mxu0 %v2684_v16 }
 0x182   :  { %1876 = vmatprep.subr.bf16.mxu0 %v2689_v19 }
 0x185   :  { %1877 = vmatpush1.bf16.msra.mxu0 %v2687_v21 }
 0x186   :  { %1878 = vmatprep.subr.bf16.mxu0 %v2692_v22 }
 0x189   :  { %1879 = vmatpush1.bf16.msra.mxu0 %v2690_v23 }
 0x18a   :  { %1880 = vmatprep.subr.bf16.mxu0 %v2695_v24 }
 0x18d   :  { %1881 = vmatpush1.bf16.msra.mxu0 %v2693_v25 }
 0x18e   :  { %1882 = vmatprep.subr.bf16.mxu0 %v2698_v27 }
 0x191   :  { %1883 = vmatpush1.bf16.msra.mxu0 %v2696_v28 }
 0x192   :  { %1884 = vmatprep.subr.bf16.mxu0 %v2701_v30 }
 0x195   :  { %1885 = vmatpush1.bf16.msra.mxu0 %v2699_v31 }
 0x196   :  { %1886 = vmatprep.subr.bf16.mxu0 %v2704_v32 }
 0x199   :  { %1887 = vmatpush1.bf16.msra.mxu0 %v2702_v33 }
 0x19a   :  { %1888 = vmatprep.subr.bf16.mxu0 %v2707_v34 }
 0x19d   :  { %1889 = vmatpush1.bf16.msra.mxu0 %v2705_v35 }
 0x19e   :  { %1890 = vmatprep.subr.bf16.mxu0 %v2710_v36  ;;  %v486_v36 = vsub.s32 6, %v3025_v17 }
 0x1a1   :  { %1891 = vmatpush1.bf16.msra.mxu0 %v2708_v37  ;;  %v487_v37 = vrot.slane %v3543_v42, %v486_v36 }
 0x1a2   :  { %1892 = vmatprep.subr.bf16.mxu0 %v2713_v38 }
 0x1a5   :  { %1893 = vmatpush1.bf16.msra.mxu0 %v2711_v41 }
 0x1a8   :  { %1895 = vmatmul.mubr.bf16.vlgmr.msra.gmra.mrb[4].mxu0 %v3074_v61  ;;  %v475_v61 = vrot.slane %v3543_v42, %v46_v29 }
 0x1fb   :  { %v1724_v46 = vpop.f32.mrb[0].mxu0  ;;  %v1810_v47 = vpop.f32.mrb[8].mxu1 }
 0x1fc   :  { %v2355_v48 = vadd.f32 %v1724_v46, %v463_v43  ;;  %v2359_v49 = vadd.f32 %v1810_v47, %v471_v44  ;;  %v1726_v50 = vpop.f32.mrb[1].mxu0  ;;  %v1812_v51 = vpop.f32.mrb[9].mxu1 }
 0x1fd   :  { %v2356_v52 = vadd.f32 %v1726_v50, %v467_v45  ;;  %v2360_v18 = vadd.f32 %v1812_v51, %v475_v61  ;;  %v1728_v53 = vpop.f32.mrb[2].mxu0  ;;  %v1814_v54 = vpop.f32.mrb[10].mxu1 }
 0x1fe   :  { %v1987_v55 = vmul.f32 0.5, %v2355_v48  ;;  %v1989_v26 = vmul.f32 0.5, %v2359_v49  ;;  %v2357_v56 = vadd.f32 %v1728_v53, %v463_v43  ;;  %v2361_v57 = vadd.f32 %v1814_v54, %v471_v44  ;;  %v1730_v58 = vpop.f32.mrb[3].mxu0  ;;  %v1816_v20 = vpop.f32.mrb[11].mxu1 }
 0x1ff   :  { %v1988_v59 = vmul.f32 0.5, %v2356_v52  ;;  %v1990_v60 = vmul.f32 0.5, %v2360_v18  ;;  %v2358_v62 = vadd.f32 %v1730_v58, %v467_v45  ;;  %v2362_v29 = vadd.f32 %v1816_v20, %v475_v61 }
 0x200   :  { %2714 = vtanh.f32 %v1987_v55  ;;  %v1994_v63 = vmul.f32 0.5, %v2357_v56  ;;  %v1996_v1 = vmul.f32 0.5, %v2361_v57  ;;  %v478_v56 = vsub.s32 4, %v3025_v17 }
 0x201   :  { %2716 = vtanh.f32 %v1989_v26  ;;  %v1995_v2 = vmul.f32 0.5, %v2358_v62  ;;  %v1997_v3 = vmul.f32 0.5, %v2362_v29  ;;  %v482_v57 = vsub.s32 5, %v3025_v17 }
 0x202   :  { %2718 = vtanh.f32 %v1988_v59  ;;  %v479_v58 = vrot.slane %v3543_v42, %v478_v56 }
 0x203   :  { %2720 = vtanh.f32 %v1990_v60  ;;  %v483_v20 = vrot.slane %v3543_v42, %v482_v57 }
 0x204   :  { %2722 = vtanh.f32 %v1994_v63 }
 0x205   :  { %2724 = vtanh.f32 %v1996_v1 }
 0x206   :  { %2726 = vtanh.f32 %v1995_v2 }
 0x207   :  { %2728 = vtanh.f32 %v1997_v3 }
 0x20a   :  { %v2715_v4 = vpop.eup %2714 }
 0x20b   :  { %v2717_v5 = vpop.eup %2716  ;;  %v2015_v6 = vadd.f32 1.0, %v2715_v4 }
 0x20c   :  { %v2719_v7 = vpop.eup %2718  ;;  %v2017_v8 = vadd.f32 1.0, %v2717_v5 }
 0x20d   :  { %v2721_v40 = vpop.eup %2720  ;;  %v2029_v9 = vmul.f32 0.5, %v2015_v6  ;;  %v2016_v10 = vadd.f32 1.0, %v2719_v7 }
 0x20e   :  { %v2723_v39 = vpop.eup %2722  ;;  %v2031_v0 = vmul.f32 0.5, %v2017_v8  ;;  %v2018_v11 = vadd.f32 1.0, %v2721_v40 }
 0x20f   :  { %v2725_v12 = vpop.eup %2724  ;;  %2043 = vst [vmem:[#allocation2] sm:$0xff] %v2029_v9  ;;  %v2030_v13 = vmul.f32 0.5, %v2016_v10  ;;  %v2022_v14 = vadd.f32 1.0, %v2723_v39 }
 0x210   :  { %v2727_v15 = vpop.eup %2726  ;;  %2045 = vst [vmem:[#allocation2 + $0x10] sm:$0xff] %v2031_v0  ;;  %v2032_v16 = vmul.f32 0.5, %v2018_v11  ;;  %v2024_v19 = vadd.f32 1.0, %v2725_v12 }
 0x211   :  { %v2729_v21 = vpop.eup %2728  ;;  %2044 = vst [vmem:[#allocation2 + $0x8] sm:$0xff] %v2030_v13  ;;  %v2036_v22 = vmul.f32 0.5, %v2022_v14  ;;  %v2023_v23 = vadd.f32 1.0, %v2727_v15 }
 0x212   :  { %2046 = vst [vmem:[#allocation2 + $0x18] sm:$0xff] %v2032_v16  ;;  %v2038_v24 = vmul.f32 0.5, %v2024_v19  ;;  %v2025_v25 = vadd.f32 1.0, %v2729_v21 }
 0x213   :  { %2051 = vst [vmem:[#allocation2 + $0x38] sm:$0xff] %v2036_v22  ;;  %v2037_v27 = vmul.f32 0.5, %v2023_v23 }
 0x214   :  { %2053 = vst [vmem:[#allocation2 + $0x48] sm:$0xff] %v2038_v24  ;;  %v2039_v28 = vmul.f32 0.5, %v2025_v25 }
 0x215   :  { %2052 = vst [vmem:[#allocation2 + $0x40] sm:$0xff] %v2037_v27 }
 0x216   :  { %2054 = vst [vmem:[#allocation2 + $0x50] sm:$0xff] %v2039_v28 }
 0x21c   :  { %v2327_v30 = vpop.f32.mrb[12].mxu1 }
 0x21d   :  { %v2328_v31 = vpop.f32.mrb[13].mxu1 }
 0x21e   :  { %v2329_v32 = vadd.f32 %v2328_v31, %v2327_v30  ;;  %v2330_v33 = vpop.f32.mrb[14].mxu1 }
 0x21f   :  { %v2331_v34 = vpop.f32.mrb[15].mxu1 }
 0x220   :  { %v2332_v35 = vadd.f32 %v2331_v34, %v2330_v33  ;;  %v1940_v43 = vadd.f32 %v2329_v32, %v487_v37 }
 0x222   :  { %v1943_v46 = vadd.f32 %v2332_v35, %v487_v37 }
 0x23c   :  { %v2349_v38 = vpop.f32.mrb[16].mxu1 }
 0x23d   :  { %v2350_v41 = vpop.f32.mrb[17].mxu1 }
 0x23e   :  { %v2351_v44 = vadd.f32 %v2350_v41, %v2349_v38  ;;  %v2352_v45 = vpop.f32.mrb[18].mxu1 }
 0x23f   :  { %v2353_v61 = vpop.f32.mrb[19].mxu1 }
 0x240   :  { %v1981_v47 = vadd.f32 %v2351_v44, %v1940_v43  ;;  %v2354_v48 = vadd.f32 %v2353_v61, %v2352_v45 }
 0x242   :  { %v1993_v49 = vmul.f32 0.5, %v1981_v47  ;;  %v1984_v50 = vadd.f32 %v2354_v48, %v1943_v46 }
 0x244   :  { %2730 = vtanh.f32 %v1993_v49  ;;  %v2000_v51 = vmul.f32 0.5, %v1984_v50 }
 0x246   :  { %2732 = vtanh.f32 %v2000_v51 }
 0x24e   :  { %v2731_v52 = vpop.eup %2730 }
 0x24f   :  { %v2021_v18 = vadd.f32 1.0, %v2731_v52 }
 0x250   :  { %v2733_v53 = vpop.eup %2732 }
 0x251   :  { %v2035_v54 = vmul.f32 0.5, %v2021_v18  ;;  %v2028_v55 = vadd.f32 1.0, %v2733_v53 }
 0x253   :  { %2050 = vst.msk [vmem:[#allocation2 + $0x30] sm:$0xff] %vm2049_vm2, %v2035_v54  ;;  %v2042_v26 = vmul.f32 0.5, %v2028_v55 }
 0x255   :  { %2057 = vst.msk [vmem:[#allocation2 + $0x68] sm:$0xff] %vm2049_vm2, %v2042_v26 }
 0x27b   :  { %v1896_v59 = vpop.f32.mrb[4].mxu0 }
 0x27c   :  { %v2363_v60 = vadd.f32 %v1896_v59, %v479_v58  ;;  %v1898_v62 = vpop.f32.mrb[5].mxu0 }
 0x27d   :  { %v2364_v29 = vadd.f32 %v1898_v62, %v483_v20  ;;  %v1900_v63 = vpop.f32.mrb[6].mxu0 }
 0x27e   :  { %v1991_v1 = vmul.f32 0.5, %v2363_v60  ;;  %v2365_v2 = vadd.f32 %v1900_v63, %v479_v58  ;;  %v1902_v3 = vpop.f32.mrb[7].mxu0 }
 0x27f   :  { %v1992_v4 = vmul.f32 0.5, %v2364_v29  ;;  %v2366_v5 = vadd.f32 %v1902_v3, %v483_v20 }
 0x280   :  { %2734 = vtanh.f32 %v1991_v1  ;;  %v1998_v6 = vmul.f32 0.5, %v2365_v2 }
 0x281   :  { %2736 = vtanh.f32 %v1992_v4  ;;  %v1999_v7 = vmul.f32 0.5, %v2366_v5 }
 0x282   :  { %2738 = vtanh.f32 %v1998_v6 }
 0x283   :  { %2740 = vtanh.f32 %v1999_v7 }
 0x28a   :  { %v2735_v17 = vpop.eup %2734 }
 0x28b   :  { %v2737_v8 = vpop.eup %2736  ;;  %v2019_v40 = vadd.f32 1.0, %v2735_v17 }
 0x28c   :  { %v2739_v42 = vpop.eup %2738  ;;  %v2020_v9 = vadd.f32 1.0, %v2737_v8 }
 0x28d   :  { %v2741_v10 = vpop.eup %2740  ;;  %v2033_v39 = vmul.f32 0.5, %v2019_v40  ;;  %v2026_v0 = vadd.f32 1.0, %v2739_v42 }
 0x28e   :  { %v2034_v11 = vmul.f32 0.5, %v2020_v9  ;;  %v2027_v12 = vadd.f32 1.0, %v2741_v10 }
 0x28f   :  { %2047 = vst [vmem:[#allocation2 + $0x20] sm:$0xff] %v2033_v39  ;;  %v2040_v13 = vmul.f32 0.5, %v2026_v0 }
 0x290   :  { %2048 = vst [vmem:[#allocation2 + $0x28] sm:$0xff] %v2034_v11  ;;  %v2041_v14 = vmul.f32 0.5, %v2027_v12 }
 0x291   :  { %2055 = vst [vmem:[#allocation2 + $0x58] sm:$0xff] %v2040_v13 }
 0x292   :  { %2056 = vst [vmem:[#allocation2 + $0x60] sm:$0xff] %v2041_v14 }
 0x293   :  { %2753 = shalt.err (!%p2750_p4)
}
 0x294   :  { %s2754_s16 = scalar_lea.hbm %s3580_s5, 1792 }
 0x295   :  { %p2755_p5 = scmp.ne.s32.totalorder %s3580_s5, %s2754_s16  ;;  %p2758_p6 = scmp.lt.u32.totalorder %s2754_s16, %s3580_s5 }
 0x297   :  { %p2760_p7 = pnand %p2758_p6, %p2755_p5 }
 0x299   :  { %2763 = shalt.err (!%p2760_p7)
}
 0x29a   :  { %s2768_s21 = smov 896   ;;  %s2769_s22 = smov 56  }
 0x29b   :  { %2069 = dma.vmem_to_hbm [thread:$0]  %s2064_s4, 1792, %s3580_s5, [#allocation3], %s2768_s21, %s2768_s21, %s2769_s22  }
 0x29c   :  { %2764 = dma.done.wait [#allocation3], 1792  }
 0x29d   :  { %2765 = vsyncadd [#allocation3], 4294965504 }
 0x29e   :  { %2073 = vsyncpa [#allocation3], 1 }

</bundles_post_ra>
